<compile_context>
chip_gen: v7x
topology: tpu7x:2x2x1
jax: 0.10.0
libtpu: 0.0.40
codegen_flags: <defaults>
</compile_context>

<pallas_src>
import math
import jax
import jax.numpy as jnp
from jax.experimental import pallas as pl
from jax.experimental.pallas import tpu as pltpu


def _round_up(n, m):
    return ((n + m - 1) // m) * m


def _pick_tm(B):
    """Choose the batch tile."""
    Bp8 = _round_up(B, 8)
    if Bp8 <= 256:
        # Single grid step: every block equals the full (padded) array, so no
        # alignment constraints and no padding waste beyond the 8-row floor.
        return Bp8
    # Multi-step: the lane-dense (1, tm) output block needs tm % 128 == 0.
    # Pick the largest tile (<= 1024) keeping batch-padding waste <= ~12.5%.
    tm = 128
    for cand in (256, 512, 1024):
        Bp = _round_up(B, cand)
        if Bp - B <= Bp // 8:
            tm = cand
    # v7x megacore: prefer >= 2 grid steps so both TensorCores get work.
    while tm > 128 and _round_up(B, tm) // tm < 2:
        tm //= 2
    return tm


def _discriminator_kernel(x_ref, w1_ref, b1_ref, w2_ref, b2_ref, w3_ref, b3_ref, o_ref):
    # Layer 1: Linear(784 -> 512) + ReLU.
    # x arrives as f32 and is cast to bf16 here (saves a wrapper-side HBM pass);
    # bf16 operands, f32 accumulation on the MXU.
    h1 = jnp.dot(x_ref[...].astype(jnp.bfloat16), w1_ref[...],
                 preferred_element_type=jnp.float32)
    h1 = jnp.maximum(h1 + b1_ref[...], 0.0)

    # Layer 2: Linear(512 -> 256) + ReLU.
    h2 = jnp.dot(h1.astype(jnp.bfloat16), w2_ref[...],
                 preferred_element_type=jnp.float32)
    h2 = jnp.maximum(h2 + b2_ref[...], 0.0)

    # Layer 3: Linear(256 -> 1) as a VPU multiply + lane reduction (an N=1 MXU
    # matmul would waste the MXU).  w3_ref is the (1, 256) weight row, b3 is an
    # SMEM scalar.  Result is a (tm,) vector of logits.
    logits = jnp.sum(h2 * w3_ref[...], axis=-1) + b3_ref[0]

    # Sigmoid via EUP exp + approximate reciprocal (keeps VALU slots free).
    probs = pl.reciprocal(1.0 + jnp.exp(-logits), approx=True)

    # Lane-dense store: one (1, tm) row per grid step.
    o_ref[...] = probs.astype(o_ref.dtype)[None, :]


def prepare_params(params):
    """One-time conversion of f32 (in,out)-layout params into kernel operands.
    Hoisted out of the forward path so each call does no weight pad/cast work."""
    w1, b1, w2, b2, w3, b3 = params
    return (
        w1.astype(jnp.bfloat16),                    # (784, 512) bf16
        b1.reshape(1, 512).astype(jnp.float32),     # (1, 512)  f32
        w2.astype(jnp.bfloat16),                    # (512, 256) bf16
        b2.reshape(1, 256).astype(jnp.float32),     # (1, 256)  f32
        w3.reshape(1, 256).astype(jnp.float32),     # (1, 256)  f32 row
        b3.reshape((1,)).astype(jnp.float32),       # (1,)      SMEM scalar
    )


def discriminator_forward(x, prepared_params, *, tm=None):
    """x: (B, ...) flattened to (B, 784); returns (B, 1) sigmoid probabilities."""
    w1, b1, w2, b2, w3_row, b3 = prepared_params
    B = x.shape[0]
    x2d = x.reshape(B, 784).astype(jnp.float32)

    if tm is None:
        tm = _pick_tm(B)
    Bp = _round_up(B, tm)
    assert tm % 8 == 0 and (tm % 128 == 0 or tm == Bp), (tm, Bp)
    if Bp != B:
        x2d = jnp.pad(x2d, ((0, Bp - B), (0, 0)))
    n_steps = Bp // tm

    full = lambda i: (0, 0)  # weights / biases are fully resident for every tile

    # Big tiles only: raise the scoped-VMEM limit explicitly (v5e default is
    # 16 MiB); small tiles stay under every generation's default.
    vmem_limit = 48 * 1024 * 1024 if tm > 256 else None

    out = pl.pallas_call(
        _discriminator_kernel,
        out_shape=jax.ShapeDtypeStruct((1, Bp), jnp.float32),
        grid_spec=pltpu.PrefetchScalarGridSpec(
            num_scalar_prefetch=0,
            grid=(n_steps,),
            in_specs=[
                pl.BlockSpec((tm, 784), lambda i: (i, 0)),          # x tile (f32, streams)
                pl.BlockSpec((784, 512), full),                     # W1 (in, out) bf16
                pl.BlockSpec((1, 512), full),                       # b1
                pl.BlockSpec((512, 256), full),                     # W2 bf16
                pl.BlockSpec((1, 256), full),                       # b2
                pl.BlockSpec((1, 256), full),                       # W3 row
                pl.BlockSpec(memory_space=pltpu.MemorySpace.SMEM),  # b3 scalar
            ],
            out_specs=pl.BlockSpec((1, tm), lambda i: (0, i)),      # lane-dense row
        ),
        compiler_params=pltpu.CompilerParams(
            dimension_semantics=("parallel",),
            vmem_limit_bytes=vmem_limit,
        ),
    )(x2d, w1, b1, w2, b2, w3_row, b3)

    return out.reshape(Bp, 1)[:B]


def init_params(key):
    """Deterministic init mimicking nn.Linear's default U(-1/sqrt(fan_in), +1/sqrt(fan_in)).
    Weights are stored transposed: (in_features, out_features)."""
    def linear(k, fan_in, fan_out):
        kw, kb = jax.random.split(k)
        bound = 1.0 / math.sqrt(fan_in)
        w = jax.random.uniform(kw, (fan_in, fan_out), jnp.float32, -bound, bound)
        b = jax.random.uniform(kb, (1, fan_out), jnp.float32, -bound, bound)
        return w, b

    k1, k2, k3 = jax.random.split(key, 3)
    w1, b1 = linear(k1, 784, 512)
    w2, b2 = linear(k2, 512, 256)
    w3, b3 = linear(k3, 256, 1)
    return w1, b1, w2, b2, w3, b3


def _reference(x, params):
    """Pure f32 reference matching the PyTorch forward."""
    w1, b1, w2, b2, w3, b3 = params
    h = x.reshape(x.shape[0], 784).astype(jnp.float32)
    h = jnp.maximum(h @ w1 + b1, 0.0)
    h = jnp.maximum(h @ w2 + b2, 0.0)
    return jax.nn.sigmoid(h @ w3 + b3)


if __name__ == "__main__":
    key = jax.random.PRNGKey(0)
    kp, kx1, kx2 = jax.random.split(key, 3)
    params = init_params(kp)
    kparams = prepare_params(params)

    # Small MNIST-like batch (NCHW images, flattened to 784 in forward()).
    # Single grid step, tm == 8.
    x = jax.random.normal(kx1, (8, 1, 28, 28), jnp.float32)
    out = jax.block_until_ready(discriminator_forward(x, kparams))
    ref = _reference(x, params)
    assert out.shape == (8, 1), out.shape
    err = float(jnp.max(jnp.abs(out - ref)))
    assert err < 2e-2, err  # bf16 matmuls + approx reciprocal vs f32 reference

    # Non-tile-multiple batch: exercises batch padding and a multi-step grid
    # (tm = 128, Bp = 384, 3 grid steps).
    x2 = jax.random.normal(kx2, (300, 784), jnp.float32)
    out2 = jax.block_until_ready(discriminator_forward(x2, kparams))
    ref2 = _reference(x2, params)
    assert out2.shape == (300, 1), out2.shape
    err2 = float(jnp.max(jnp.abs(out2 - ref2)))
    assert err2 < 2e-2, err2

    print("KERNEL_OK")
</pallas_src>

<mosaic_0001>
module attributes {stable_mosaic.version = 11 : i64} {
  func.func @_discriminator_kernel(%arg0: i32, %arg1: memref<8x784xf32, #tpu.memory_space<vmem>>, %arg2: memref<784x512xbf16, #tpu.memory_space<vmem>>, %arg3: memref<1x512xf32, #tpu.memory_space<vmem>>, %arg4: memref<512x256xbf16, #tpu.memory_space<vmem>>, %arg5: memref<1x256xf32, #tpu.memory_space<vmem>>, %arg6: memref<1x256xf32, #tpu.memory_space<vmem>>, %arg7: memref<1xf32, #tpu.memory_space<smem>>, %arg8: memref<1x8xf32, #tpu.memory_space<vmem>>) attributes {dimension_semantics = [#tpu.dimension_semantics<parallel>], iteration_bounds = array<i64: 1>, scalar_prefetch = 0 : i64, scratch_operands = 0 : i64, tpu.core_type = #tpu.core_type<tc>, window_params = [{transform_indices = @transform_0, window_bounds = array<i64: 8, 784>}, {pipeline_mode = #tpu.pipeline_mode<synchronous>, transform_indices = @transform_1, window_bounds = array<i64: 784, 512>}, {pipeline_mode = #tpu.pipeline_mode<synchronous>, transform_indices = @transform_2, window_bounds = array<i64: 1, 512>}, {pipeline_mode = #tpu.pipeline_mode<synchronous>, transform_indices = @transform_3, window_bounds = array<i64: 512, 256>}, {pipeline_mode = #tpu.pipeline_mode<synchronous>, transform_indices = @transform_4, window_bounds = array<i64: 1, 256>}, {pipeline_mode = #tpu.pipeline_mode<synchronous>, transform_indices = @transform_5, window_bounds = array<i64: 1, 256>}, {transform_indices = @transform_6, window_bounds = array<i64: 1>}, {transform_indices = @transform_7, window_bounds = array<i64: 1, 8>}]} {
    %c0 = arith.constant 0 : index
    %c0_0 = arith.constant 0 : index
    %0 = vector.load %arg1[%c0, %c0_0] : memref<8x784xf32, #tpu.memory_space<vmem>>, vector<8x784xf32>
    %1 = arith.truncf %0 : vector<8x784xf32> to vector<8x784xbf16>
    %c0_1 = arith.constant 0 : index
    %c0_2 = arith.constant 0 : index
    %2 = vector.load %arg2[%c0_1, %c0_2] : memref<784x512xbf16, #tpu.memory_space<vmem>>, vector<784x512xbf16>
    %cst = arith.constant dense<0.000000e+00> : vector<8x512xf32>
    %3 = tpu.matmul %1, %2, %cst {dimension_numbers = #tpu.dot_dimension_numbers<[1], [0], [0], [1], [0, 0, 1, 1], [], []>} : vector<8x784xbf16>, vector<784x512xbf16>, vector<8x512xf32> -> vector<8x512xf32>
    %c0_3 = arith.constant 0 : index
    %c0_4 = arith.constant 0 : index
    %4 = vector.load %arg3[%c0_3, %c0_4] : memref<1x512xf32, #tpu.memory_space<vmem>>, vector<1x512xf32>
    %5 = vector.broadcast %4 : vector<1x512xf32> to vector<8x512xf32>
    %6 = arith.addf %3, %5 : vector<8x512xf32>
    %cst_5 = arith.constant 0.000000e+00 : f32
    %7 = vector.broadcast %cst_5 : f32 to vector<8x512xf32>
    %8 = arith.maximumf %6, %7 : vector<8x512xf32>
    %9 = arith.truncf %8 : vector<8x512xf32> to vector<8x512xbf16>
    %c0_6 = arith.constant 0 : index
    %c0_7 = arith.constant 0 : index
    %10 = vector.load %arg4[%c0_6, %c0_7] : memref<512x256xbf16, #tpu.memory_space<vmem>>, vector<512x256xbf16>
    %cst_8 = arith.constant dense<0.000000e+00> : vector<8x256xf32>
    %11 = tpu.matmul %9, %10, %cst_8 {dimension_numbers = #tpu.dot_dimension_numbers<[1], [0], [0], [1], [0, 0, 1, 1], [], []>} : vector<8x512xbf16>, vector<512x256xbf16>, vector<8x256xf32> -> vector<8x256xf32>
    %c0_9 = arith.constant 0 : index
    %c0_10 = arith.constant 0 : index
    %12 = vector.load %arg5[%c0_9, %c0_10] : memref<1x256xf32, #tpu.memory_space<vmem>>, vector<1x256xf32>
    %13 = vector.broadcast %12 : vector<1x256xf32> to vector<8x256xf32>
    %14 = arith.addf %11, %13 : vector<8x256xf32>
    %cst_11 = arith.constant 0.000000e+00 : f32
    %15 = vector.broadcast %cst_11 : f32 to vector<8x256xf32>
    %16 = arith.maximumf %14, %15 : vector<8x256xf32>
    %c0_12 = arith.constant 0 : index
    %c0_13 = arith.constant 0 : index
    %17 = vector.load %arg6[%c0_12, %c0_13] : memref<1x256xf32, #tpu.memory_space<vmem>>, vector<1x256xf32>
    %18 = vector.broadcast %17 : vector<1x256xf32> to vector<8x256xf32>
    %19 = arith.mulf %16, %18 : vector<8x256xf32>
    %cst_14 = arith.constant dense<0.000000e+00> : vector<8xf32>
    %20 = vector.multi_reduction <add>, %19, %cst_14 [1] : vector<8x256xf32> to vector<8xf32>
    %c0_15 = arith.constant 0 : index
    %21 = memref.load %arg7[%c0_15] : memref<1xf32, #tpu.memory_space<smem>>
    %22 = vector.broadcast %21 : f32 to vector<8xf32>
    %23 = arith.addf %20, %22 : vector<8xf32>
    %cst_16 = arith.constant 0.000000e+00 : f32
    %24 = vector.broadcast %cst_16 : f32 to vector<8xf32>
    %25 = arith.subf %24, %23 : vector<8xf32>
    %26 = math.exp %25 : vector<8xf32>
    %cst_17 = arith.constant 1.000000e+00 : f32
    %27 = vector.broadcast %cst_17 : f32 to vector<8xf32>
    %28 = arith.addf %27, %26 : vector<8xf32>
    %29 = tpu.reciprocal %28 {approx = true} : vector<8xf32> -> vector<8xf32>
    %30 = vector.shape_cast %29 : vector<8xf32> to vector<1x8xf32>
    %c0_18 = arith.constant 0 : index
    %c0_19 = arith.constant 0 : index
    %31 = vector.load %arg8[%c0_18, %c0_19] : memref<1x8xf32, #tpu.memory_space<vmem>>, vector<1x8xf32>
    tpu.vector_store %arg8[%c0_18, %c0_19], %30 {strides = array<i32>} : memref<1x8xf32, #tpu.memory_space<vmem>>, vector<1x8xf32>,
    return
  }
  func.func @transform_0(%arg0: i32) -> (i32, i32) {
    %c0_i32 = arith.constant 0 : i32
    %c0_i32_0 = arith.constant 0 : i32
    return %arg0, %c0_i32 : i32, i32
  }
  func.func @transform_1(%arg0: i32) -> (i32, i32) {
    %c0_i32 = arith.constant 0 : i32
    %c0_i32_0 = arith.constant 0 : i32
    %c0_i32_1 = arith.constant 0 : i32
    return %c0_i32, %c0_i32_0 : i32, i32
  }
  func.func @transform_2(%arg0: i32) -> (i32, i32) {
    %c0_i32 = arith.constant 0 : i32
    %c0_i32_0 = arith.constant 0 : i32
    %c0_i32_1 = arith.constant 0 : i32
    return %c0_i32, %c0_i32_0 : i32, i32
  }
  func.func @transform_3(%arg0: i32) -> (i32, i32) {
    %c0_i32 = arith.constant 0 : i32
    %c0_i32_0 = arith.constant 0 : i32
    %c0_i32_1 = arith.constant 0 : i32
    return %c0_i32, %c0_i32_0 : i32, i32
  }
  func.func @transform_4(%arg0: i32) -> (i32, i32) {
    %c0_i32 = arith.constant 0 : i32
    %c0_i32_0 = arith.constant 0 : i32
    %c0_i32_1 = arith.constant 0 : i32
    return %c0_i32, %c0_i32_0 : i32, i32
  }
  func.func @transform_5(%arg0: i32) -> (i32, i32) {
    %c0_i32 = arith.constant 0 : i32
    %c0_i32_0 = arith.constant 0 : i32
    %c0_i32_1 = arith.constant 0 : i32
    return %c0_i32, %c0_i32_0 : i32, i32
  }
  func.func @transform_6(%arg0: i32) -> i32 {
    %c0_i32 = arith.constant 0 : i32
    %c0_i32_0 = arith.constant 0 : i32
    return %c0_i32 : i32
  }
  func.func @transform_7(%arg0: i32) -> (i32, i32) {
    %c0_i32 = arith.constant 0 : i32
    %c0_i32_0 = arith.constant 0 : i32
    return %c0_i32, %arg0 : i32, i32
  }
}

</mosaic_0001>

<bundles_post_ra>
// kernel: tpu_custom_call.1
= control target key start
LH: loop header
LB: loop body
LE: loop exit
PB: predicated region body
PF: predicated region fallthrough
CT: control target
= control target key end

     0   :  { %13 = vsyncpa [#allocation4], 0  ;;  %s3108_s0 = inlined_call_operand.hbm [shape: f32[8,784], index: 0, kind: input, shape index: {}]   ;;  %s3109_s1 = inlined_call_operand.hbm [shape: bf16[784,512], index: 1, kind: input, shape index: {}]   ;;  %s3110_s2 = inlined_call_operand.vmem [shape: f32[1,512], index: 2, kind: input, shape index: {}]   ;;  %s3111_s3 = inlined_call_operand.hbm [shape: bf16[512,256], index: 3, kind: input, shape index: {}]   ;;  %s3112_s4 = inlined_call_operand.vmem [shape: f32[1,256], index: 4, kind: input, shape index: {}]   ;;  %s3113_s5 = inlined_call_operand.vmem [shape: f32[1,256], index: 5, kind: input, shape index: {}]   ;;  %s3114_s6 = inlined_call_operand.<no memory space> [shape: f32[1], index: 6, kind: input, shape index: {}]   ;;  %s3115_s7 = inlined_call_operand.hbm [shape: f32[1,8], index: 7, kind: output, shape index: {}]  }
   0x1   :  { %14 = vsyncpa [#allocation7], 0 }
   0x2   :  { %15 = vsyncpa [#allocation5], 0  ;;  %s2942_s24 = smov [#allocation6]   ;;  %s2848_s28 = scalar_lea.hbm %s3109_s1, 25088 }
   0x3   :  { %s31_s25 = sshll.u32 %s2942_s24, 4  ;;  %p2849_p0 = scmp.ne.s32.totalorder %s3109_s1, %s2848_s28  ;;  %s32_s25 = int_to_ptr.vmem [resolvable:$true] %s31_s25 }
   0x4   :  { %p2852_p1 = scmp.lt.u32.totalorder %s2848_s28, %s3109_s1 }
   0x6   :  { %p2854_p2 = pnand %p2852_p1, %p2849_p0 }
   0x8   :  { %2857 = shalt.err (!%p2854_p2)
}
   0x9   :  { %s2858_s10 = scalar_lea.vmem %s32_s25, 25088  ;;  %p2863_p4 = scmp.lt.s32.totalorder %s32_s25, %s32_s25 }
   0xa   :  { %p2859_p3 = scmp.ne.s32.totalorder %s32_s25, %s2858_s10  ;;  %p2864_p5 = scmp.lt.s32.totalorder %s2858_s10, %s2858_s10 }
   0xc   :  { %p2865_p6 = por %p2864_p5, %p2863_p4 }
   0xe   :  { %p2866_p7 = pnand %p2865_p6, %p2859_p3 }
  0x10   :  { %2869 = shalt.err (!%p2866_p7)
}
  0x11   :  { %s2943_s11 = smov 256   ;;  %s2944_s12 = smov 16  }
  0x12   :  { %37 = dma.hbm_to_vmem [thread:$0]  %s3109_s1, 25088, %s32_s25, [#allocation7], %s2943_s11, %s2943_s11, %s2944_s12  }
  0x13   :  { %s2945_s15 = smov [#allocation3]   ;;  %s2946_s17 = smov [#allocation8]  }
  0x14   :  { %s22_s16 = sshll.u32 %s2945_s15, 4  ;;  %s45_s18 = sshll.u32 %s2946_s17, 4  ;;  %s23_s16 = int_to_ptr.vmem [resolvable:$true] %s22_s16  ;;  %s46_s18 = int_to_ptr.vmem [resolvable:$true] %s45_s18 }
  0x15   :  { %s2870_s21 = scalar_lea.hbm %s3108_s0, 896 }
  0x16   :  { %p2871_p8 = scmp.ne.s32.totalorder %s3108_s0, %s2870_s21  ;;  %p2874_p9 = scmp.lt.u32.totalorder %s2870_s21, %s3108_s0 }
  0x18   :  { %p2876_p10 = pnand %p2874_p9, %p2871_p8 }
  0x1a   :  { %2879 = shalt.err (!%p2876_p10)
}
  0x1b   :  { %s2880_s1 = scalar_lea.vmem %s23_s16, 896  ;;  %p2885_p12 = scmp.lt.s32.totalorder %s23_s16, %s23_s16 }
  0x1c   :  { %p2881_p11 = scmp.ne.s32.totalorder %s23_s16, %s2880_s1  ;;  %p2886_p13 = scmp.lt.s32.totalorder %s2880_s1, %s2880_s1 }
  0x1e   :  { %p2887_p0 = por %p2886_p13, %p2885_p12 }
  0x20   :  { %p2888_p1 = pnand %p2887_p0, %p2881_p11 }
  0x22   :  { %2891 = shalt.err (!%p2888_p1)
}
  0x23   :  { %25 = dma.hbm_to_vmem [thread:$0]  %s3108_s0, 896, %s23_s16, [#allocation4]  }
  0x24   :  { %s2892_s30 = scalar_lea.hbm %s3111_s3, 8192 }
  0x25   :  { %p2893_p2 = scmp.ne.s32.totalorder %s3111_s3, %s2892_s30  ;;  %p2896_p3 = scmp.lt.u32.totalorder %s2892_s30, %s3111_s3 }
  0x27   :  { %p2898_p4 = pnand %p2896_p3, %p2893_p2 }
  0x29   :  { %2901 = shalt.err (!%p2898_p4)
}
  0x2a   :  { %s2902_s12 = scalar_lea.vmem %s46_s18, 8192  ;;  %p2907_p6 = scmp.lt.s32.totalorder %s46_s18, %s46_s18 }
  0x2b   :  { %p2903_p5 = scmp.ne.s32.totalorder %s46_s18, %s2902_s12  ;;  %p2908_p7 = scmp.lt.s32.totalorder %s2902_s12, %s2902_s12 }
  0x2d   :  { %p2909_p8 = por %p2908_p7, %p2907_p6 }
  0x2f   :  { %p2910_p9 = pnand %p2909_p8, %p2903_p5 }
  0x31   :  { %2913 = shalt.err (!%p2910_p9)
}
  0x32   :  { %s2947_s0 = smov 128   ;;  %s2948_s13 = smov 8  }
  0x33   :  { %51 = dma.hbm_to_vmem [thread:$0]  %s3111_s3, 8192, %s46_s18, [#allocation7], %s2947_s0, %s2947_s0, %s2948_s13  }
  0x34   :  { %2936 = dma.done.wait [#allocation4], 896  }
  0x35   :  { %2937 = vsyncadd [#allocation4], 4294966400 }
  0x36   :  { %2938 = dma.done.wait [#allocation7], 33280  }
  0x37   :  { %2939 = vsyncadd [#allocation7], 4294934016  ;;  %v2454_v0 = vld [vmem:[#allocation6 + $0x4] ss:$16 sps:$4 sm:$0xff]   ;;  %v2458_v2 = vld [vmem:[#allocation6] ss:$16 sps:$4 sm:$0xff]  }
  0x38   :  { %v2456_v1 = vld [vmem:[#allocation6 + $0x204] ss:$16 sps:$4 sm:$0xff]   ;;  %1284 = vmatprep.subr.bf16.mxu1 %v2454_v0  ;;  %v2459_v3 = vld [vmem:[#allocation6 + $0x200] ss:$16 sps:$4 sm:$0xff]   ;;  %vm1280_vm0 = vcmask 130048   ;;  %vm2133_vm1 = vcmask 57344  }
  0x39   :  { %1325 = vmatprep.subr.bf16.mxu0 %v2456_v1  ;;  %v2460_v4 = vld [vmem:[#allocation6 + $0x24] ss:$16 sps:$4 sm:$0xff]   ;;  %1285 = vmatpush1.bf16.msra.mxu1 %v2458_v2  ;;  %v2464_v6 = vld [vmem:[#allocation6 + $0x20] ss:$16 sps:$4 sm:$0xff]  }
  0x3a   :  { %1326 = vmatpush1.bf16.msra.mxu0 %v2459_v3  ;;  %v2462_v5 = vld [vmem:[#allocation6 + $0x224] ss:$16 sps:$4 sm:$0xff]   ;;  %1286 = vmatprep.subr.bf16.mxu1 %v2460_v4  ;;  %v2465_v7 = vld [vmem:[#allocation6 + $0x220] ss:$16 sps:$4 sm:$0xff]   ;;  %v68_v4 = vld [vmem:[#allocation3] sm:$0xff] }
  0x3b   :  { %1327 = vmatprep.subr.bf16.mxu0 %v2462_v5  ;;  %v2466_v8 = vld [vmem:[#allocation6 + $0x44] ss:$16 sps:$4 sm:$0xff]   ;;  %v2470_v10 = vld [vmem:[#allocation6 + $0x40] ss:$16 sps:$4 sm:$0xff]  }
  0x3c   :  { %v2468_v9 = vld [vmem:[#allocation6 + $0x244] ss:$16 sps:$4 sm:$0xff]   ;;  %v2471_v11 = vld [vmem:[#allocation6 + $0x240] ss:$16 sps:$4 sm:$0xff]  }
  0x3d   :  { %1287 = vmatpush1.bf16.msra.mxu1 %v2464_v6  ;;  %v2472_v12 = vld [vmem:[#allocation6 + $0x64] ss:$16 sps:$4 sm:$0xff]   ;;  %v2476_v14 = vld [vmem:[#allocation6 + $0x60] ss:$16 sps:$4 sm:$0xff]   ;;  %v70_v6 = vld [vmem:[#allocation3 + $0x10] sm:$0xff] }
  0x3e   :  { %1328 = vmatpush1.bf16.msra.mxu0 %v2465_v7  ;;  %1288 = vmatprep.subr.bf16.mxu1 %v2466_v8  ;;  %v2474_v13 = vld [vmem:[#allocation6 + $0x264] ss:$16 sps:$4 sm:$0xff]   ;;  %v2477_v15 = vld [vmem:[#allocation6 + $0x260] ss:$16 sps:$4 sm:$0xff]   ;;  %v2555_v7 = vld [vmem:[#allocation6 + $0xc] ss:$16 sps:$4 sm:$0xff]   ;;  %v3033_v8 = vpack.c.bf16 %v68_v4, %v68_v4 }
  0x3f   :  { %1329 = vmatprep.subr.bf16.mxu0 %v2468_v9  ;;  %v2478_v16 = vld [vmem:[#allocation6 + $0x84] ss:$16 sps:$4 sm:$0xff]   ;;  %v2482_v18 = vld [vmem:[#allocation6 + $0x80] ss:$16 sps:$4 sm:$0xff]   ;;  %v2639_v4 = vld [vmem:[#allocation6 + $0x1cc] ss:$16 sps:$4 sm:$0xff]  }
  0x40   :  { %v2480_v17 = vld [vmem:[#allocation6 + $0x284] ss:$16 sps:$4 sm:$0xff]   ;;  %v2483_v19 = vld [vmem:[#allocation6 + $0x280] ss:$16 sps:$4 sm:$0xff]  }
  0x41   :  { %1289 = vmatpush1.bf16.msra.mxu1 %v2470_v10  ;;  %v2484_v20 = vld [vmem:[#allocation6 + $0xa4] ss:$16 sps:$4 sm:$0xff]   ;;  %v2488_v22 = vld [vmem:[#allocation6 + $0xa0] ss:$16 sps:$4 sm:$0xff]   ;;  %v2553_v10 = vld [vmem:[#allocation6 + $0x8] ss:$16 sps:$4 sm:$0xff]  }
  0x42   :  { %1330 = vmatpush1.bf16.msra.mxu0 %v2471_v11  ;;  %1290 = vmatprep.subr.bf16.mxu1 %v2472_v12  ;;  %v2486_v21 = vld [vmem:[#allocation6 + $0x2a4] ss:$16 sps:$4 sm:$0xff]   ;;  %v2489_v23 = vld [vmem:[#allocation6 + $0x2a0] ss:$16 sps:$4 sm:$0xff]   ;;  %v3035_v11 = vpack.c.bf16 %v70_v6, %v70_v6  ;;  %v2637_v6 = vld [vmem:[#allocation6 + $0x1c8] ss:$16 sps:$4 sm:$0xff]  }
  0x43   :  { %1331 = vmatprep.subr.bf16.mxu0 %v2474_v13  ;;  %v2490_v24 = vld [vmem:[#allocation6 + $0xc4] ss:$16 sps:$4 sm:$0xff]   ;;  %v2494_v26 = vld [vmem:[#allocation6 + $0xc0] ss:$16 sps:$4 sm:$0xff]   ;;  %v2561_v13 = vld [vmem:[#allocation6 + $0x2c] ss:$16 sps:$4 sm:$0xff]  }
  0x44   :  { %v2492_v25 = vld [vmem:[#allocation6 + $0x2c4] ss:$16 sps:$4 sm:$0xff]   ;;  %v2495_v27 = vld [vmem:[#allocation6 + $0x2c0] ss:$16 sps:$4 sm:$0xff]  }
  0x45   :  { %1291 = vmatpush1.bf16.msra.mxu1 %v2476_v14  ;;  %v2496_v28 = vld [vmem:[#allocation6 + $0xe4] ss:$16 sps:$4 sm:$0xff]   ;;  %v2500_v30 = vld [vmem:[#allocation6 + $0xe0] ss:$16 sps:$4 sm:$0xff]  }
  0x46   :  { %1332 = vmatpush1.bf16.msra.mxu0 %v2477_v15  ;;  %1292 = vmatprep.subr.bf16.mxu1 %v2478_v16  ;;  %v2498_v29 = vld [vmem:[#allocation6 + $0x2e4] ss:$16 sps:$4 sm:$0xff]   ;;  %v2501_v31 = vld [vmem:[#allocation6 + $0x2e0] ss:$16 sps:$4 sm:$0xff]   ;;  %v2559_v15 = vld [vmem:[#allocation6 + $0x28] ss:$16 sps:$4 sm:$0xff]  }
  0x47   :  { %1333 = vmatprep.subr.bf16.mxu0 %v2480_v17  ;;  %v2502_v32 = vld [vmem:[#allocation6 + $0x104] ss:$16 sps:$4 sm:$0xff]   ;;  %v2506_v34 = vld [vmem:[#allocation6 + $0x100] ss:$16 sps:$4 sm:$0xff]   ;;  %v2567_v17 = vld [vmem:[#allocation6 + $0x4c] ss:$16 sps:$4 sm:$0xff]  }
  0x48   :  { %v2504_v33 = vld [vmem:[#allocation6 + $0x304] ss:$16 sps:$4 sm:$0xff]   ;;  %v2507_v35 = vld [vmem:[#allocation6 + $0x300] ss:$16 sps:$4 sm:$0xff]  }
  0x49   :  { %1293 = vmatpush1.bf16.msra.mxu1 %v2482_v18  ;;  %v2508_v36 = vld [vmem:[#allocation6 + $0x124] ss:$16 sps:$4 sm:$0xff]   ;;  %v2512_v38 = vld [vmem:[#allocation6 + $0x120] ss:$16 sps:$4 sm:$0xff]  }
  0x4a   :  { %1334 = vmatpush1.bf16.msra.mxu0 %v2483_v19  ;;  %1294 = vmatprep.subr.bf16.mxu1 %v2484_v20  ;;  %v2510_v37 = vld [vmem:[#allocation6 + $0x324] ss:$16 sps:$4 sm:$0xff]   ;;  %v2513_v39 = vld [vmem:[#allocation6 + $0x320] ss:$16 sps:$4 sm:$0xff]   ;;  %v2565_v19 = vld [vmem:[#allocation6 + $0x48] ss:$16 sps:$4 sm:$0xff]  }
  0x4b   :  { %1335 = vmatprep.subr.bf16.mxu0 %v2486_v21  ;;  %v2514_v40 = vld [vmem:[#allocation6 + $0x144] ss:$16 sps:$4 sm:$0xff]   ;;  %v2518_v42 = vld [vmem:[#allocation6 + $0x140] ss:$16 sps:$4 sm:$0xff]   ;;  %v2573_v21 = vld [vmem:[#allocation6 + $0x6c] ss:$16 sps:$4 sm:$0xff]  }
  0x4c   :  { %v2516_v41 = vld [vmem:[#allocation6 + $0x344] ss:$16 sps:$4 sm:$0xff]   ;;  %v2519_v43 = vld [vmem:[#allocation6 + $0x340] ss:$16 sps:$4 sm:$0xff]  }
  0x4d   :  { %1295 = vmatpush1.bf16.msra.mxu1 %v2488_v22  ;;  %v2520_v44 = vld [vmem:[#allocation6 + $0x164] ss:$16 sps:$4 sm:$0xff]   ;;  %v2524_v47 = vld [vmem:[#allocation6 + $0x160] ss:$16 sps:$4 sm:$0xff]  }
  0x4e   :  { %1336 = vmatpush1.bf16.msra.mxu0 %v2489_v23  ;;  %1296 = vmatprep.subr.bf16.mxu1 %v2490_v24  ;;  %v2522_v45 = vld [vmem:[#allocation6 + $0x364] ss:$16 sps:$4 sm:$0xff]   ;;  %v2525_v50 = vld [vmem:[#allocation6 + $0x360] ss:$16 sps:$4 sm:$0xff]   ;;  %v2571_v23 = vld [vmem:[#allocation6 + $0x68] ss:$16 sps:$4 sm:$0xff]  }
  0x4f   :  { %1337 = vmatprep.subr.bf16.mxu0 %v2492_v25  ;;  %v69_v46 = vld [vmem:[#allocation3 + $0x8] sm:$0xff]  ;;  %v71_v49 = vld [vmem:[#allocation3 + $0x18] sm:$0xff]  ;;  %v2579_v25 = vld [vmem:[#allocation6 + $0x8c] ss:$16 sps:$4 sm:$0xff]  }
  0x50   :  { %v3027_v48 = vpack.c.bf16 %v69_v46, %v69_v46  ;;  %v2526_v51 = vld [vmem:[#allocation6 + $0x184] ss:$16 sps:$4 sm:$0xff]   ;;  %v3029_v52 = vpack.c.bf16 %v71_v49, %v71_v49  ;;  %v2530_v54 = vld [vmem:[#allocation6 + $0x180] ss:$16 sps:$4 sm:$0xff]   ;;  %v2607_v49 = vld [vmem:[#allocation6 + $0x128] ss:$16 sps:$4 sm:$0xff]  }
  0x51   :  { %1297 = vmatpush1.bf16.msra.mxu1 %v2494_v26  ;;  %v2528_v53 = vld [vmem:[#allocation6 + $0x384] ss:$16 sps:$4 sm:$0xff]   ;;  %v2531_v55 = vld [vmem:[#allocation6 + $0x380] ss:$16 sps:$4 sm:$0xff]  }
  0x52   :  { %1338 = vmatpush1.bf16.msra.mxu0 %v2495_v27  ;;  %1298 = vmatprep.subr.bf16.mxu1 %v2496_v28  ;;  %v2532_v56 = vld [vmem:[#allocation6 + $0x1a4] ss:$16 sps:$4 sm:$0xff]   ;;  %v2536_v58 = vld [vmem:[#allocation6 + $0x1a0] ss:$16 sps:$4 sm:$0xff]   ;;  %v2577_v27 = vld [vmem:[#allocation6 + $0x88] ss:$16 sps:$4 sm:$0xff]  }
  0x53   :  { %1339 = vmatprep.subr.bf16.mxu0 %v2498_v29  ;;  %1316 = vmatprep.mubr.bf16.mxu1 %v3027_v48  ;;  %v2534_v57 = vld [vmem:[#allocation6 + $0x3a4] ss:$16 sps:$4 sm:$0xff]   ;;  %v2537_v59 = vld [vmem:[#allocation6 + $0x3a0] ss:$16 sps:$4 sm:$0xff]   ;;  %v2585_v29 = vld [vmem:[#allocation6 + $0xac] ss:$16 sps:$4 sm:$0xff]  }
  0x54   :  { %1357 = vmatprep.mubr.bf16.mxu0 %v3029_v52  ;;  %v2538_v60 = vld [vmem:[#allocation6 + $0x1c4] ss:$16 sps:$4 sm:$0xff]   ;;  %v2542_v62 = vld [vmem:[#allocation6 + $0x1c0] ss:$16 sps:$4 sm:$0xff]  }
  0x55   :  { %1299 = vmatpush1.bf16.msra.mxu1 %v2500_v30  ;;  %v2540_v61 = vld [vmem:[#allocation6 + $0x3c4] ss:$16 sps:$4 sm:$0xff]   ;;  %v2543_v63 = vld [vmem:[#allocation6 + $0x3c0] ss:$16 sps:$4 sm:$0xff]  }
  0x56   :  { %1340 = vmatpush1.bf16.msra.mxu0 %v2501_v31  ;;  %1300 = vmatprep.subr.bf16.mxu1 %v2502_v32  ;;  %v2544_v0 = vld [vmem:[#allocation6 + $0x1e4] ss:$16 sps:$4 sm:$0xff]   ;;  %v2548_v2 = vld [vmem:[#allocation6 + $0x1e0] ss:$16 sps:$4 sm:$0xff]   ;;  %v2583_v31 = vld [vmem:[#allocation6 + $0xa8] ss:$16 sps:$4 sm:$0xff]  }
  0x57   :  { %1341 = vmatprep.subr.bf16.mxu0 %v2504_v33  ;;  %v2546_v1 = vld [vmem:[#allocation6 + $0x3e4] ss:$16 sps:$4 sm:$0xff]   ;;  %v2549_v3 = vld [vmem:[#allocation6 + $0x3e0] ss:$16 sps:$4 sm:$0xff]   ;;  %v2591_v33 = vld [vmem:[#allocation6 + $0xcc] ss:$16 sps:$4 sm:$0xff]  }
  0x58   :  { %v2552_v5 = vld [vmem:[#allocation6 + $0x404] ss:$16 sps:$4 sm:$0xff]   ;;  %v2550_v9 = vld [vmem:[#allocation6 + $0x400] ss:$16 sps:$4 sm:$0xff]  }
  0x59   :  { %1301 = vmatpush1.bf16.msra.mxu1 %v2506_v34  ;;  %v2558_v12 = vld [vmem:[#allocation6 + $0x424] ss:$16 sps:$4 sm:$0xff]   ;;  %v2556_v14 = vld [vmem:[#allocation6 + $0x420] ss:$16 sps:$4 sm:$0xff]  }
  0x5a   :  { %1342 = vmatpush1.bf16.msra.mxu0 %v2507_v35  ;;  %1302 = vmatprep.subr.bf16.mxu1 %v2508_v36  ;;  %v2564_v16 = vld [vmem:[#allocation6 + $0x444] ss:$16 sps:$4 sm:$0xff]   ;;  %v2562_v18 = vld [vmem:[#allocation6 + $0x440] ss:$16 sps:$4 sm:$0xff]  }
  0x5b   :  { %1343 = vmatprep.subr.bf16.mxu0 %v2510_v37  ;;  %v2570_v20 = vld [vmem:[#allocation6 + $0x464] ss:$16 sps:$4 sm:$0xff]   ;;  %v2568_v22 = vld [vmem:[#allocation6 + $0x460] ss:$16 sps:$4 sm:$0xff]   ;;  %v2589_v37 = vld [vmem:[#allocation6 + $0xc8] ss:$16 sps:$4 sm:$0xff]  }
  0x5c   :  { %v2576_v24 = vld [vmem:[#allocation6 + $0x484] ss:$16 sps:$4 sm:$0xff]   ;;  %v2574_v26 = vld [vmem:[#allocation6 + $0x480] ss:$16 sps:$4 sm:$0xff]  }
  0x5d   :  { %1303 = vmatpush1.bf16.msra.mxu1 %v2512_v38  ;;  %v2582_v28 = vld [vmem:[#allocation6 + $0x4a4] ss:$16 sps:$4 sm:$0xff]   ;;  %v2580_v30 = vld [vmem:[#allocation6 + $0x4a0] ss:$16 sps:$4 sm:$0xff]  }
  0x5e   :  { %1344 = vmatpush1.bf16.msra.mxu0 %v2513_v39  ;;  %1304 = vmatprep.subr.bf16.mxu1 %v2514_v40  ;;  %v2588_v32 = vld [vmem:[#allocation6 + $0x4c4] ss:$16 sps:$4 sm:$0xff]   ;;  %v2586_v36 = vld [vmem:[#allocation6 + $0x4c0] ss:$16 sps:$4 sm:$0xff]   ;;  %v2597_v39 = vld [vmem:[#allocation6 + $0xec] ss:$16 sps:$4 sm:$0xff]  }
  0x5f   :  { %1345 = vmatprep.subr.bf16.mxu0 %v2516_v41  ;;  %v73_v34 = vld [vmem:[#allocation3 + $0x28] sm:$0xff]  ;;  %v2595_v41 = vld [vmem:[#allocation6 + $0xe8] ss:$16 sps:$4 sm:$0xff]  }
  0x60   :  { %v3040_v35 = vpack.c.bf16 %v73_v34, %v73_v34  ;;  %v2594_v38 = vld [vmem:[#allocation6 + $0x4e4] ss:$16 sps:$4 sm:$0xff]   ;;  %v2592_v40 = vld [vmem:[#allocation6 + $0x4e0] ss:$16 sps:$4 sm:$0xff]  }
  0x61   :  { %1305 = vmatpush1.bf16.msra.mxu1 %v2518_v42  ;;  %v2600_v42 = vld [vmem:[#allocation6 + $0x504] ss:$16 sps:$4 sm:$0xff]  }
  0x62   :  { %1346 = vmatpush1.bf16.msra.mxu0 %v2519_v43  ;;  %1306 = vmatprep.subr.bf16.mxu1 %v2520_v44  ;;  %v2603_v43 = vld [vmem:[#allocation6 + $0x10c] ss:$16 sps:$4 sm:$0xff]   ;;  %v2598_v44 = vld [vmem:[#allocation6 + $0x500] ss:$16 sps:$4 sm:$0xff]   ;;  %v2606_v46 = vld [vmem:[#allocation6 + $0x524] ss:$16 sps:$4 sm:$0xff]  }
  0x63   :  { %1347 = vmatprep.subr.bf16.mxu0 %v2522_v45  ;;  %v2601_v45 = vld [vmem:[#allocation6 + $0x108] ss:$16 sps:$4 sm:$0xff]   ;;  %v2750_v34 = vld [vmem:[#allocation8 + $0x4] ss:$8 sps:$4 sm:$0xff]  }
  0x65   :  { %1307 = vmatpush1.bf16.msra.mxu1 %v2524_v47  ;;  %v2609_v47 = vld [vmem:[#allocation6 + $0x12c] ss:$16 sps:$4 sm:$0xff]  }
  0x66   :  { %1348 = vmatpush1.bf16.msra.mxu0 %v2525_v50  ;;  %1308 = vmatprep.subr.bf16.mxu1 %v2526_v51  ;;  %v2612_v50 = vld [vmem:[#allocation6 + $0x544] ss:$16 sps:$4 sm:$0xff]   ;;  %v2615_v51 = vld [vmem:[#allocation6 + $0x14c] ss:$16 sps:$4 sm:$0xff]  }
  0x67   :  { %1349 = vmatprep.subr.bf16.mxu0 %v2528_v53  ;;  %v2610_v53 = vld [vmem:[#allocation6 + $0x540] ss:$16 sps:$4 sm:$0xff]  }
  0x69   :  { %1309 = vmatpush1.bf16.msra.mxu1 %v2530_v54  ;;  %v2613_v54 = vld [vmem:[#allocation6 + $0x148] ss:$16 sps:$4 sm:$0xff]  }
  0x6a   :  { %1350 = vmatpush1.bf16.msra.mxu0 %v2531_v55  ;;  %1310 = vmatprep.subr.bf16.mxu1 %v2532_v56  ;;  %v2618_v55 = vld [vmem:[#allocation6 + $0x564] ss:$16 sps:$4 sm:$0xff]   ;;  %v2621_v56 = vld [vmem:[#allocation6 + $0x16c] ss:$16 sps:$4 sm:$0xff]  }
  0x6b   :  { %1351 = vmatprep.subr.bf16.mxu0 %v2534_v57  ;;  %v2616_v57 = vld [vmem:[#allocation6 + $0x560] ss:$16 sps:$4 sm:$0xff]  }
  0x6d   :  { %1311 = vmatpush1.bf16.msra.mxu1 %v2536_v58  ;;  %v2619_v58 = vld [vmem:[#allocation6 + $0x168] ss:$16 sps:$4 sm:$0xff]  }
  0x6e   :  { %1352 = vmatpush1.bf16.msra.mxu0 %v2537_v59  ;;  %1312 = vmatprep.subr.bf16.mxu1 %v2538_v60  ;;  %v2624_v59 = vld [vmem:[#allocation6 + $0x584] ss:$16 sps:$4 sm:$0xff]   ;;  %v2627_v60 = vld [vmem:[#allocation6 + $0x18c] ss:$16 sps:$4 sm:$0xff]  }
  0x6f   :  { %1353 = vmatprep.subr.bf16.mxu0 %v2540_v61  ;;  %v2622_v61 = vld [vmem:[#allocation6 + $0x580] ss:$16 sps:$4 sm:$0xff]  }
  0x71   :  { %1313 = vmatpush1.bf16.msra.mxu1 %v2542_v62  ;;  %v2625_v62 = vld [vmem:[#allocation6 + $0x188] ss:$16 sps:$4 sm:$0xff]  }
  0x72   :  { %1354 = vmatpush1.bf16.msra.mxu0 %v2543_v63  ;;  %1314 = vmatprep.subr.bf16.mxu1 %v2544_v0  ;;  %v2630_v63 = vld [vmem:[#allocation6 + $0x5a4] ss:$16 sps:$4 sm:$0xff]   ;;  %v2633_v0 = vld [vmem:[#allocation6 + $0x1ac] ss:$16 sps:$4 sm:$0xff]  }
  0x73   :  { %1355 = vmatprep.subr.bf16.mxu0 %v2546_v1  ;;  %v2628_v1 = vld [vmem:[#allocation6 + $0x5a0] ss:$16 sps:$4 sm:$0xff]  }
  0x75   :  { %1315 = vmatpush1.bf16.msra.mxu1 %v2548_v2  ;;  %v2631_v2 = vld [vmem:[#allocation6 + $0x1a8] ss:$16 sps:$4 sm:$0xff]  }
  0x76   :  { %1356 = vmatpush1.bf16.msra.mxu0 %v2549_v3  ;;  %1448 = vmatprep.subr.bf16.mxu1 %v2555_v7  ;;  %v2636_v3 = vld [vmem:[#allocation6 + $0x5c4] ss:$16 sps:$4 sm:$0xff]  }
  0x77   :  { %1366 = vmatprep.subr.bf16.mxu0 %v2552_v5  ;;  %v2634_v5 = vld [vmem:[#allocation6 + $0x5c0] ss:$16 sps:$4 sm:$0xff]   ;;  %v2642_v7 = vld [vmem:[#allocation6 + $0x5e4] ss:$16 sps:$4 sm:$0xff]  }
  0x78   :  { %1317 = vmatmul.mubr.bf16.vlgmr.msra.gmra.mrb[0].mxu1 %v3033_v8 }
  0x79   :  { %1358 = vmatmul.mubr.bf16.vlgmr.msra.gmra.mrb[0].mxu0 %v3035_v11  ;;  %1449 = vmatpush1.bf16.msra.mxu1 %v2553_v10  ;;  %v2640_v10 = vld [vmem:[#allocation6 + $0x5e0] ss:$16 sps:$4 sm:$0xff]  }
  0x7a   :  { %1367 = vmatpush1.bf16.msra.mxu0 %v2550_v9  ;;  %1450 = vmatprep.subr.bf16.mxu1 %v2561_v13  ;;  %v2645_v9 = vld [vmem:[#allocation6 + $0x1ec] ss:$16 sps:$4 sm:$0xff]  }
  0x7b   :  { %1368 = vmatprep.subr.bf16.mxu0 %v2558_v12  ;;  %1480 = vmatprep.mubr.bf16.mxu1 %v3027_v48  ;;  %v2604_v48 = vld [vmem:[#allocation6 + $0x520] ss:$16 sps:$4 sm:$0xff]   ;;  %v2643_v12 = vld [vmem:[#allocation6 + $0x1e8] ss:$16 sps:$4 sm:$0xff]  }
  0x7c   :  { %1398 = vmatprep.mubr.bf16.mxu0 %v3040_v35  ;;  %v72_v13 = vld [vmem:[#allocation3 + $0x20] sm:$0xff] }
  0x7d   :  { %1451 = vmatpush1.bf16.msra.mxu1 %v2559_v15  ;;  %v2654_v15 = vld [vmem:[#allocation6 + $0x604] ss:$16 sps:$4 sm:$0xff]  }
  0x7e   :  { %1369 = vmatpush1.bf16.msra.mxu0 %v2556_v14  ;;  %1452 = vmatprep.subr.bf16.mxu1 %v2567_v17  ;;  %v2648_v14 = vld [vmem:[#allocation6 + $0x20c] ss:$16 sps:$4 sm:$0xff]   ;;  %v2646_v17 = vld [vmem:[#allocation6 + $0x208] ss:$16 sps:$4 sm:$0xff]  }
  0x7f   :  { %1370 = vmatprep.subr.bf16.mxu0 %v2564_v16  ;;  %v3043_v16 = vpack.c.bf16 %v72_v13, %v72_v13  ;;  %v2702_v13 = vld [vmem:[#allocation6 + $0x42c] ss:$16 sps:$4 sm:$0xff]  }
  0x81   :  { %1453 = vmatpush1.bf16.msra.mxu1 %v2565_v19  ;;  %v2651_v19 = vld [vmem:[#allocation6 + $0x22c] ss:$16 sps:$4 sm:$0xff]  }
  0x82   :  { %1371 = vmatpush1.bf16.msra.mxu0 %v2562_v18  ;;  %1454 = vmatprep.subr.bf16.mxu1 %v2573_v21  ;;  %v2652_v18 = vld [vmem:[#allocation6 + $0x600] ss:$16 sps:$4 sm:$0xff]   ;;  %v2657_v21 = vld [vmem:[#allocation6 + $0x24c] ss:$16 sps:$4 sm:$0xff]  }
  0x83   :  { %1372 = vmatprep.subr.bf16.mxu0 %v2570_v20  ;;  %v2649_v20 = vld [vmem:[#allocation6 + $0x228] ss:$16 sps:$4 sm:$0xff]  }
  0x85   :  { %1455 = vmatpush1.bf16.msra.mxu1 %v2571_v23  ;;  %v2655_v23 = vld [vmem:[#allocation6 + $0x248] ss:$16 sps:$4 sm:$0xff]  }
  0x86   :  { %1373 = vmatpush1.bf16.msra.mxu0 %v2568_v22  ;;  %1456 = vmatprep.subr.bf16.mxu1 %v2579_v25  ;;  %v2949_v22 = vmov 0   ;;  %v2660_v25 = vld [vmem:[#allocation6 + $0x26c] ss:$16 sps:$4 sm:$0xff]  }
  0x87   :  { %1374 = vmatprep.subr.bf16.mxu0 %v2576_v24  ;;  %v74_v24 = vld [vmem:[#allocation3 + $0x30] sm:$0xff] }
  0x89   :  { %1457 = vmatpush1.bf16.msra.mxu1 %v2577_v27  ;;  %v3049_v27 = vpack.c.bf16 %v74_v24, %v74_v24  ;;  %v2784_v24 = vld [vmem:[#allocation8 + $0xc0] ss:$8 sps:$4 sm:$0xff]  }
  0x8a   :  { %1375 = vmatpush1.bf16.msra.mxu0 %v2574_v26  ;;  %1458 = vmatprep.subr.bf16.mxu1 %v2585_v29  ;;  %v2658_v26 = vld [vmem:[#allocation6 + $0x268] ss:$16 sps:$4 sm:$0xff]   ;;  %v2666_v29 = vld [vmem:[#allocation6 + $0x2ac] ss:$16 sps:$4 sm:$0xff]  }
  0x8b   :  { %1376 = vmatprep.subr.bf16.mxu0 %v2582_v28  ;;  %v2663_v28 = vld [vmem:[#allocation6 + $0x28c] ss:$16 sps:$4 sm:$0xff]  }
  0x8d   :  { %1459 = vmatpush1.bf16.msra.mxu1 %v2583_v31  ;;  %v2669_v31 = vld [vmem:[#allocation6 + $0x2cc] ss:$16 sps:$4 sm:$0xff]  }
  0x8e   :  { %1377 = vmatpush1.bf16.msra.mxu0 %v2580_v30  ;;  %1460 = vmatprep.subr.bf16.mxu1 %v2591_v33  ;;  %v2664_v30 = vld [vmem:[#allocation6 + $0x2a8] ss:$16 sps:$4 sm:$0xff]  }
  0x8f   :  { %1378 = vmatprep.subr.bf16.mxu0 %v2588_v32  ;;  %v2672_v32 = vld [vmem:[#allocation6 + $0x2ec] ss:$16 sps:$4 sm:$0xff]   ;;  %v2748_v33 = vld [vmem:[#allocation8] ss:$8 sps:$4 sm:$0xff]  }
  0x91   :  { %1461 = vmatpush1.bf16.msra.mxu1 %v2589_v37  ;;  %v2670_v37 = vld [vmem:[#allocation6 + $0x2e8] ss:$16 sps:$4 sm:$0xff]  }
  0x92   :  { %1379 = vmatpush1.bf16.msra.mxu0 %v2586_v36  ;;  %1462 = vmatprep.subr.bf16.mxu1 %v2597_v39  ;;  %v2753_v36 = vld [vmem:[#allocation8 + $0x14] ss:$8 sps:$4 sm:$0xff]  }
  0x93   :  { %1380 = vmatprep.subr.bf16.mxu0 %v2594_v38  ;;  %v2751_v38 = vld [vmem:[#allocation8 + $0x10] ss:$8 sps:$4 sm:$0xff]   ;;  %v2675_v39 = vld [vmem:[#allocation6 + $0x30c] ss:$16 sps:$4 sm:$0xff]  }
  0x95   :  { %1463 = vmatpush1.bf16.msra.mxu1 %v2595_v41  ;;  %v2673_v41 = vld [vmem:[#allocation6 + $0x308] ss:$16 sps:$4 sm:$0xff]  }
  0x96   :  { %1381 = vmatpush1.bf16.msra.mxu0 %v2592_v40  ;;  %1464 = vmatprep.subr.bf16.mxu1 %v2603_v43  ;;  %v2756_v40 = vld [vmem:[#allocation8 + $0x24] ss:$8 sps:$4 sm:$0xff]  }
  0x97   :  { %1382 = vmatprep.subr.bf16.mxu0 %v2600_v42  ;;  %v2754_v42 = vld [vmem:[#allocation8 + $0x20] ss:$8 sps:$4 sm:$0xff]   ;;  %v2678_v43 = vld [vmem:[#allocation6 + $0x32c] ss:$16 sps:$4 sm:$0xff]  }
  0x99   :  { %1465 = vmatpush1.bf16.msra.mxu1 %v2601_v45  ;;  %v2676_v45 = vld [vmem:[#allocation6 + $0x328] ss:$16 sps:$4 sm:$0xff]  }
  0x9a   :  { %1383 = vmatpush1.bf16.msra.mxu0 %v2598_v44  ;;  %1466 = vmatprep.subr.bf16.mxu1 %v2609_v47  ;;  %v2759_v44 = vld [vmem:[#allocation8 + $0x34] ss:$8 sps:$4 sm:$0xff]  }
  0x9b   :  { %1384 = vmatprep.subr.bf16.mxu0 %v2606_v46  ;;  %v2757_v46 = vld [vmem:[#allocation8 + $0x30] ss:$8 sps:$4 sm:$0xff]   ;;  %v2681_v47 = vld [vmem:[#allocation6 + $0x34c] ss:$16 sps:$4 sm:$0xff]  }
  0x9d   :  { %1467 = vmatpush1.bf16.msra.mxu1 %v2607_v49  ;;  %v2679_v49 = vld [vmem:[#allocation6 + $0x348] ss:$16 sps:$4 sm:$0xff]  }
  0x9e   :  { %1385 = vmatpush1.bf16.msra.mxu0 %v2604_v48  ;;  %1468 = vmatprep.subr.bf16.mxu1 %v2615_v51  ;;  %v2762_v48 = vld [vmem:[#allocation8 + $0x44] ss:$8 sps:$4 sm:$0xff]  }
  0x9f   :  { %1386 = vmatprep.subr.bf16.mxu0 %v2612_v50  ;;  %v2760_v50 = vld [vmem:[#allocation8 + $0x40] ss:$8 sps:$4 sm:$0xff]   ;;  %v2684_v51 = vld [vmem:[#allocation6 + $0x36c] ss:$16 sps:$4 sm:$0xff]  }
  0xa1   :  { %1469 = vmatpush1.bf16.msra.mxu1 %v2613_v54  ;;  %v2682_v54 = vld [vmem:[#allocation6 + $0x368] ss:$16 sps:$4 sm:$0xff]  }
  0xa2   :  { %1387 = vmatpush1.bf16.msra.mxu0 %v2610_v53  ;;  %1470 = vmatprep.subr.bf16.mxu1 %v2621_v56  ;;  %v2765_v53 = vld [vmem:[#allocation8 + $0x54] ss:$8 sps:$4 sm:$0xff]  }
  0xa3   :  { %1388 = vmatprep.subr.bf16.mxu0 %v2618_v55  ;;  %v2763_v55 = vld [vmem:[#allocation8 + $0x50] ss:$8 sps:$4 sm:$0xff]   ;;  %v2687_v56 = vld [vmem:[#allocation6 + $0x38c] ss:$16 sps:$4 sm:$0xff]  }
  0xa5   :  { %1471 = vmatpush1.bf16.msra.mxu1 %v2619_v58  ;;  %v2685_v58 = vld [vmem:[#allocation6 + $0x388] ss:$16 sps:$4 sm:$0xff]  }
  0xa6   :  { %1389 = vmatpush1.bf16.msra.mxu0 %v2616_v57  ;;  %1472 = vmatprep.subr.bf16.mxu1 %v2627_v60  ;;  %v2768_v57 = vld [vmem:[#allocation8 + $0x64] ss:$8 sps:$4 sm:$0xff]  }
  0xa7   :  { %1390 = vmatprep.subr.bf16.mxu0 %v2624_v59  ;;  %v2766_v59 = vld [vmem:[#allocation8 + $0x60] ss:$8 sps:$4 sm:$0xff]   ;;  %v2690_v60 = vld [vmem:[#allocation6 + $0x3ac] ss:$16 sps:$4 sm:$0xff]  }
  0xa9   :  { %1473 = vmatpush1.bf16.msra.mxu1 %v2625_v62  ;;  %v2688_v62 = vld [vmem:[#allocation6 + $0x3a8] ss:$16 sps:$4 sm:$0xff]  }
  0xaa   :  { %1391 = vmatpush1.bf16.msra.mxu0 %v2622_v61  ;;  %1474 = vmatprep.subr.bf16.mxu1 %v2633_v0  ;;  %v2771_v61 = vld [vmem:[#allocation8 + $0x74] ss:$8 sps:$4 sm:$0xff]  }
  0xab   :  { %1392 = vmatprep.subr.bf16.mxu0 %v2630_v63  ;;  %v2769_v63 = vld [vmem:[#allocation8 + $0x70] ss:$8 sps:$4 sm:$0xff]   ;;  %v2693_v0 = vld [vmem:[#allocation6 + $0x3cc] ss:$16 sps:$4 sm:$0xff]  }
  0xad   :  { %1475 = vmatpush1.bf16.msra.mxu1 %v2631_v2  ;;  %v2691_v2 = vld [vmem:[#allocation6 + $0x3c8] ss:$16 sps:$4 sm:$0xff]  }
  0xae   :  { %1393 = vmatpush1.bf16.msra.mxu0 %v2628_v1  ;;  %1476 = vmatprep.subr.bf16.mxu1 %v2639_v4  ;;  %v2774_v1 = vld [vmem:[#allocation8 + $0x84] ss:$8 sps:$4 sm:$0xff]  }
  0xaf   :  { %1394 = vmatprep.subr.bf16.mxu0 %v2636_v3  ;;  %v2772_v3 = vld [vmem:[#allocation8 + $0x80] ss:$8 sps:$4 sm:$0xff]   ;;  %v2696_v4 = vld [vmem:[#allocation6 + $0x3ec] ss:$16 sps:$4 sm:$0xff]  }
  0xb1   :  { %1477 = vmatpush1.bf16.msra.mxu1 %v2637_v6  ;;  %v2694_v6 = vld [vmem:[#allocation6 + $0x3e8] ss:$16 sps:$4 sm:$0xff]  }
  0xb2   :  { %1395 = vmatpush1.bf16.msra.mxu0 %v2634_v5  ;;  %1478 = vmatprep.subr.bf16.mxu1 %v2645_v9  ;;  %v2777_v5 = vld [vmem:[#allocation8 + $0x94] ss:$8 sps:$4 sm:$0xff]  }
  0xb3   :  { %1396 = vmatprep.subr.bf16.mxu0 %v2642_v7  ;;  %v2775_v7 = vld [vmem:[#allocation8 + $0x90] ss:$8 sps:$4 sm:$0xff]   ;;  %v2699_v9 = vld [vmem:[#allocation6 + $0x40c] ss:$16 sps:$4 sm:$0xff]  }
  0xb5   :  { %1479 = vmatpush1.bf16.msra.mxu1 %v2643_v12  ;;  %v2697_v12 = vld [vmem:[#allocation6 + $0x408] ss:$16 sps:$4 sm:$0xff]  }
  0xb6   :  { %1397 = vmatpush1.bf16.msra.mxu0 %v2640_v10  ;;  %1489 = vmatprep.subr.bf16.mxu1 %v2648_v14  ;;  %v2780_v10 = vld [vmem:[#allocation8 + $0xa4] ss:$8 sps:$4 sm:$0xff]   ;;  %v2778_v14 = vld [vmem:[#allocation8 + $0xa0] ss:$8 sps:$4 sm:$0xff]  }
  0xb7   :  { %1407 = vmatprep.subr.bf16.mxu0 %v2654_v15  ;;  %v2783_v15 = vld [vmem:[#allocation8 + $0xb4] ss:$8 sps:$4 sm:$0xff]  }
  0xb8   :  { %1481 = vmatmul.mubr.bf16.vlgmr.msra.gmra.mrb[4].mxu1 %v3033_v8  ;;  %v2661_v8 = vld [vmem:[#allocation6 + $0x288] ss:$16 sps:$4 sm:$0xff]  }
  0xb9   :  { %1399 = vmatmul.mubr.bf16.vlgmr.msra.gmra.mrb[0].mxu0 %v3043_v16  ;;  %1490 = vmatpush1.bf16.msra.mxu1 %v2646_v17  ;;  %v2700_v17 = vld [vmem:[#allocation6 + $0x428] ss:$16 sps:$4 sm:$0xff]  }
  0xba   :  { %1408 = vmatpush1.bf16.msra.mxu0 %v2652_v18  ;;  %1491 = vmatprep.subr.bf16.mxu1 %v2651_v19  ;;  %v2705_v18 = vld [vmem:[#allocation6 + $0x44c] ss:$16 sps:$4 sm:$0xff]   ;;  %v2781_v19 = vld [vmem:[#allocation8 + $0xb0] ss:$8 sps:$4 sm:$0xff]  }
  0xbb   :  { %1439 = vmatprep.mubr.bf16.mxu0 %v2949_v22  ;;  %1521 = vmatprep.mubr.bf16.mxu1 %v3029_v52  ;;  %v2667_v52 = vld [vmem:[#allocation6 + $0x2c8] ss:$16 sps:$4 sm:$0xff]  }
  0xbc   :  { %2016 = vmatprep.subr.bf16.mxu0 %v2750_v34  ;;  %v2721_v34 = vld [vmem:[#allocation6 + $0x508] ss:$16 sps:$4 sm:$0xff]  }
  0xbd   :  { %1492 = vmatpush1.bf16.msra.mxu1 %v2649_v20  ;;  %v2786_v20 = vld [vmem:[#allocation8 + $0xc4] ss:$8 sps:$4 sm:$0xff]  }
  0xbe   :  { %1493 = vmatprep.subr.bf16.mxu1 %v2657_v21  ;;  %v2703_v21 = vld [vmem:[#allocation6 + $0x448] ss:$16 sps:$4 sm:$0xff]  }
  0xc1   :  { %1494 = vmatpush1.bf16.msra.mxu1 %v2655_v23  ;;  %v2708_v23 = vld [vmem:[#allocation6 + $0x46c] ss:$16 sps:$4 sm:$0xff]  }
  0xc2   :  { %1495 = vmatprep.subr.bf16.mxu1 %v2660_v25  ;;  %v2789_v25 = vld [vmem:[#allocation8 + $0xd4] ss:$8 sps:$4 sm:$0xff]  }
  0xc5   :  { %2347 = vmatmul.mubr.msk.bf16.vlgmr.msra.gmra.mrb[0].mxu0 %vm1280_vm0, %v3049_v27  ;;  %1496 = vmatpush1.bf16.msra.mxu1 %v2658_v26  ;;  %v2711_v26 = vld [vmem:[#allocation6 + $0x48c] ss:$16 sps:$4 sm:$0xff]  }
  0xc6   :  { %1497 = vmatprep.subr.bf16.mxu1 %v2663_v28  ;;  %2017 = vmatpush1.bf16.msra.mxu0 %v2748_v33  ;;  %v2709_v28 = vld [vmem:[#allocation6 + $0x488] ss:$16 sps:$4 sm:$0xff]   ;;  %v2723_v33 = vld [vmem:[#allocation6 + $0x50c] ss:$16 sps:$4 sm:$0xff]  }
  0xc7   :  { %2018 = vmatprep.subr.bf16.mxu0 %v2753_v36  ;;  %v2726_v36 = vld [vmem:[#allocation6 + $0x52c] ss:$16 sps:$4 sm:$0xff]  }
  0xc9   :  { %1498 = vmatpush1.bf16.msra.mxu1 %v2661_v8  ;;  %v2714_v8 = vld [vmem:[#allocation6 + $0x4ac] ss:$16 sps:$4 sm:$0xff]  }
  0xca   :  { %1499 = vmatprep.subr.bf16.mxu1 %v2666_v29  ;;  %2019 = vmatpush1.bf16.msra.mxu0 %v2751_v38  ;;  %v2712_v29 = vld [vmem:[#allocation6 + $0x4a8] ss:$16 sps:$4 sm:$0xff]  }
  0xcb   :  { %2020 = vmatprep.subr.bf16.mxu0 %v2756_v40  ;;  %v2790_v38 = vld [vmem:[#allocation8 + $0xe0] ss:$8 sps:$4 sm:$0xff]   ;;  %v2729_v40 = vld [vmem:[#allocation6 + $0x54c] ss:$16 sps:$4 sm:$0xff]  }
  0xcd   :  { %1500 = vmatpush1.bf16.msra.mxu1 %v2664_v30  ;;  %v2717_v30 = vld [vmem:[#allocation6 + $0x4cc] ss:$16 sps:$4 sm:$0xff]  }
  0xce   :  { %1501 = vmatprep.subr.bf16.mxu1 %v2669_v31  ;;  %2021 = vmatpush1.bf16.msra.mxu0 %v2754_v42  ;;  %v2715_v31 = vld [vmem:[#allocation6 + $0x4c8] ss:$16 sps:$4 sm:$0xff]  }
  0xcf   :  { %2022 = vmatprep.subr.bf16.mxu0 %v2759_v44  ;;  %v2793_v42 = vld [vmem:[#allocation8 + $0xf0] ss:$8 sps:$4 sm:$0xff]   ;;  %v2732_v44 = vld [vmem:[#allocation6 + $0x56c] ss:$16 sps:$4 sm:$0xff]  }
  0xd1   :  { %1502 = vmatpush1.bf16.msra.mxu1 %v2667_v52  ;;  %v2720_v52 = vld [vmem:[#allocation6 + $0x4ec] ss:$16 sps:$4 sm:$0xff]  }
  0xd2   :  { %1503 = vmatprep.subr.bf16.mxu1 %v2672_v32  ;;  %2023 = vmatpush1.bf16.msra.mxu0 %v2757_v46  ;;  %v2718_v32 = vld [vmem:[#allocation6 + $0x4e8] ss:$16 sps:$4 sm:$0xff]  }
  0xd3   :  { %2024 = vmatprep.subr.bf16.mxu0 %v2762_v48  ;;  %v2730_v46 = vld [vmem:[#allocation6 + $0x568] ss:$16 sps:$4 sm:$0xff]  }
  0xd4   :  { %v2733_v48 = vld [vmem:[#allocation6 + $0x588] ss:$16 sps:$4 sm:$0xff]  }
  0xd5   :  { %1504 = vmatpush1.bf16.msra.mxu1 %v2670_v37  ;;  %v2792_v37 = vld [vmem:[#allocation8 + $0xe4] ss:$8 sps:$4 sm:$0xff]  }
  0xd6   :  { %1505 = vmatprep.subr.bf16.mxu1 %v2675_v39  ;;  %2025 = vmatpush1.bf16.msra.mxu0 %v2760_v50  ;;  %v2724_v39 = vld [vmem:[#allocation6 + $0x528] ss:$16 sps:$4 sm:$0xff]  }
  0xd7   :  { %2026 = vmatprep.subr.bf16.mxu0 %v2765_v53  ;;  %v2736_v50 = vld [vmem:[#allocation6 + $0x5a8] ss:$16 sps:$4 sm:$0xff]  }
  0xd8   :  { %v2739_v53 = vld [vmem:[#allocation6 + $0x5c8] ss:$16 sps:$4 sm:$0xff]  }
  0xd9   :  { %1506 = vmatpush1.bf16.msra.mxu1 %v2673_v41  ;;  %v2795_v41 = vld [vmem:[#allocation8 + $0xf4] ss:$8 sps:$4 sm:$0xff]  }
  0xda   :  { %1507 = vmatprep.subr.bf16.mxu1 %v2678_v43  ;;  %2027 = vmatpush1.bf16.msra.mxu0 %v2763_v55  ;;  %v2727_v43 = vld [vmem:[#allocation6 + $0x548] ss:$16 sps:$4 sm:$0xff]  }
  0xdb   :  { %2028 = vmatprep.subr.bf16.mxu0 %v2768_v57  ;;  %v2742_v55 = vld [vmem:[#allocation6 + $0x5e8] ss:$16 sps:$4 sm:$0xff]  }
  0xdc   :  { %v2745_v57 = vld [vmem:[#allocation6 + $0x608] ss:$16 sps:$4 sm:$0xff]  }
  0xdd   :  { %1508 = vmatpush1.bf16.msra.mxu1 %v2676_v45  ;;  %v2798_v45 = vld [vmem:[#allocation8 + $0x104] ss:$8 sps:$4 sm:$0xff]  }
  0xde   :  { %1509 = vmatprep.subr.bf16.mxu1 %v2681_v47  ;;  %2029 = vmatpush1.bf16.msra.mxu0 %v2766_v59  ;;  %v2735_v47 = vld [vmem:[#allocation6 + $0x58c] ss:$16 sps:$4 sm:$0xff]  }
  0xdf   :  { %2030 = vmatprep.subr.bf16.mxu0 %v2771_v61 }
  0xe1   :  { %1510 = vmatpush1.bf16.msra.mxu1 %v2679_v49  ;;  %v2738_v49 = vld [vmem:[#allocation6 + $0x5ac] ss:$16 sps:$4 sm:$0xff]  }
  0xe2   :  { %1511 = vmatprep.subr.bf16.mxu1 %v2684_v51  ;;  %2031 = vmatpush1.bf16.msra.mxu0 %v2769_v63  ;;  %v2741_v51 = vld [vmem:[#allocation6 + $0x5cc] ss:$16 sps:$4 sm:$0xff]  }
  0xe3   :  { %2032 = vmatprep.subr.bf16.mxu0 %v2774_v1 }
  0xe5   :  { %1512 = vmatpush1.bf16.msra.mxu1 %v2682_v54  ;;  %v2744_v54 = vld [vmem:[#allocation6 + $0x5ec] ss:$16 sps:$4 sm:$0xff]  }
  0xe6   :  { %1513 = vmatprep.subr.bf16.mxu1 %v2687_v56  ;;  %2033 = vmatpush1.bf16.msra.mxu0 %v2772_v3  ;;  %v2747_v56 = vld [vmem:[#allocation6 + $0x60c] ss:$16 sps:$4 sm:$0xff]  }
  0xe7   :  { %2034 = vmatprep.subr.bf16.mxu0 %v2777_v5 }
  0xe9   :  { %1514 = vmatpush1.bf16.msra.mxu1 %v2685_v58 }
  0xea   :  { %1515 = vmatprep.subr.bf16.mxu1 %v2690_v60  ;;  %2035 = vmatpush1.bf16.msra.mxu0 %v2775_v7 }
  0xeb   :  { %2036 = vmatprep.subr.bf16.mxu0 %v2780_v10 }
  0xed   :  { %1516 = vmatpush1.bf16.msra.mxu1 %v2688_v62  ;;  %v280_v62 = vlaneseq }
  0xee   :  { %1517 = vmatprep.subr.bf16.mxu1 %v2693_v0  ;;  %2037 = vmatpush1.bf16.msra.mxu0 %v2778_v14 }
  0xef   :  { %2038 = vmatprep.subr.bf16.mxu0 %v2783_v15  ;;  %v3060_v63 = vshrl.u32 %v280_v62, 7  ;;  %v2796_v15 = vld [vmem:[#allocation8 + $0x100] ss:$8 sps:$4 sm:$0xff]  }
  0xf1   :  { %1518 = vmatpush1.bf16.msra.mxu1 %v2691_v2  ;;  %v3063_v0 = vsub.s32 0, %v3060_v63 }
  0xf2   :  { %1519 = vmatprep.subr.bf16.mxu1 %v2696_v4  ;;  %2039 = vmatpush1.bf16.msra.mxu0 %v2781_v19  ;;  %v2799_v19 = vld [vmem:[#allocation8 + $0x110] ss:$8 sps:$4 sm:$0xff]  }
  0xf3   :  { %2040 = vmatprep.subr.bf16.mxu0 %v2786_v20  ;;  %v2804_v20 = vld [vmem:[#allocation8 + $0x124] ss:$8 sps:$4 sm:$0xff]  }
  0xf5   :  { %1520 = vmatpush1.bf16.msra.mxu1 %v2694_v6 }
  0xf6   :  { %1530 = vmatprep.subr.bf16.mxu1 %v2699_v9  ;;  %2041 = vmatpush1.bf16.msra.mxu0 %v2784_v24  ;;  %v2805_v24 = vld [vmem:[#allocation8 + $0x130] ss:$8 sps:$4 sm:$0xff]  }
  0xf7   :  { %2042 = vmatprep.subr.bf16.mxu0 %v2789_v25  ;;  %v2810_v25 = vld [vmem:[#allocation8 + $0x144] ss:$8 sps:$4 sm:$0xff]  }
  0xf8   :  { %1522 = vmatmul.mubr.bf16.vlgmr.msra.gmra.mrb[4].mxu1 %v3035_v11  ;;  %v2706_v11 = vld [vmem:[#allocation6 + $0x468] ss:$16 sps:$4 sm:$0xff]  }
  0xf9   :  { %1531 = vmatpush1.bf16.msra.mxu1 %v2697_v12  ;;  %1562 = vmatprep.mubr.bf16.mxu1 %v3040_v35  ;;  %v2787_v35 = vld [vmem:[#allocation8 + $0xd0] ss:$8 sps:$4 sm:$0xff]  }
  0xfa   :  { %1532 = vmatprep.subr.bf16.mxu1 %v2702_v13  ;;  %2043 = vmatpush1.bf16.msra.mxu0 %v2787_v35  ;;  %v2811_v35 = vld [vmem:[#allocation8 + $0x150] ss:$8 sps:$4 sm:$0xff]  }
  0xfb   :  { %2044 = vmatprep.subr.bf16.mxu0 %v2792_v37  ;;  %v2831_v37 = vld [vmem:[#allocation8 + $0x1b4] ss:$8 sps:$4 sm:$0xff]  }
  0xfd   :  { %1533 = vmatpush1.bf16.msra.mxu1 %v2700_v17 }
  0xfe   :  { %1534 = vmatprep.subr.bf16.mxu1 %v2705_v18  ;;  %2045 = vmatpush1.bf16.msra.mxu0 %v2790_v38  ;;  %v2801_v18 = vld [vmem:[#allocation8 + $0x114] ss:$8 sps:$4 sm:$0xff]   ;;  %v2829_v38 = vld [vmem:[#allocation8 + $0x1b0] ss:$8 sps:$4 sm:$0xff]  }
  0xff   :  { %2046 = vmatprep.subr.bf16.mxu0 %v2795_v41  ;;  %v2837_v41 = vld [vmem:[#allocation8 + $0x1d4] ss:$8 sps:$4 sm:$0xff]  }
 0x101   :  { %1535 = vmatpush1.bf16.msra.mxu1 %v2703_v21  ;;  %v2802_v21 = vld [vmem:[#allocation8 + $0x120] ss:$8 sps:$4 sm:$0xff]  }
 0x102   :  { %1536 = vmatprep.subr.bf16.mxu1 %v2708_v23  ;;  %2047 = vmatpush1.bf16.msra.mxu0 %v2793_v42  ;;  %v2807_v23 = vld [vmem:[#allocation8 + $0x134] ss:$8 sps:$4 sm:$0xff]   ;;  %v2835_v42 = vld [vmem:[#allocation8 + $0x1d0] ss:$8 sps:$4 sm:$0xff]  }
 0x103   :  { %2057 = vmatprep.subr.bf16.mxu0 %v2798_v45  ;;  %v2843_v45 = vld [vmem:[#allocation8 + $0x1f4] ss:$8 sps:$4 sm:$0xff]  }
 0x105   :  { %1537 = vmatpush1.bf16.msra.mxu1 %v2706_v11  ;;  %v2808_v11 = vld [vmem:[#allocation8 + $0x140] ss:$8 sps:$4 sm:$0xff]  }
 0x106   :  { %1538 = vmatprep.subr.bf16.mxu1 %v2711_v26  ;;  %v2813_v26 = vld [vmem:[#allocation8 + $0x154] ss:$8 sps:$4 sm:$0xff]  }
 0x109   :  { %1539 = vmatpush1.bf16.msra.mxu1 %v2709_v28  ;;  %v2816_v28 = vld [vmem:[#allocation8 + $0x164] ss:$8 sps:$4 sm:$0xff]  }
 0x10a   :  { %1540 = vmatprep.subr.bf16.mxu1 %v2714_v8  ;;  %v2814_v8 = vld [vmem:[#allocation8 + $0x160] ss:$8 sps:$4 sm:$0xff]  }
 0x10d   :  { %1541 = vmatpush1.bf16.msra.mxu1 %v2712_v29  ;;  %v2819_v29 = vld [vmem:[#allocation8 + $0x174] ss:$8 sps:$4 sm:$0xff]  }
 0x10e   :  { %1542 = vmatprep.subr.bf16.mxu1 %v2717_v30  ;;  %v2817_v30 = vld [vmem:[#allocation8 + $0x170] ss:$8 sps:$4 sm:$0xff]  }
 0x111   :  { %1543 = vmatpush1.bf16.msra.mxu1 %v2715_v31  ;;  %v2822_v31 = vld [vmem:[#allocation8 + $0x184] ss:$8 sps:$4 sm:$0xff]  }
 0x112   :  { %1544 = vmatprep.subr.bf16.mxu1 %v2720_v52  ;;  %v2820_v52 = vld [vmem:[#allocation8 + $0x180] ss:$8 sps:$4 sm:$0xff]  }
 0x115   :  { %1545 = vmatpush1.bf16.msra.mxu1 %v2718_v32  ;;  %v2825_v32 = vld [vmem:[#allocation8 + $0x194] ss:$8 sps:$4 sm:$0xff]  }
 0x116   :  { %1546 = vmatprep.subr.bf16.mxu1 %v2723_v33  ;;  %v2823_v33 = vld [vmem:[#allocation8 + $0x190] ss:$8 sps:$4 sm:$0xff]  }
 0x119   :  { %1547 = vmatpush1.bf16.msra.mxu1 %v2721_v34  ;;  %v2828_v34 = vld [vmem:[#allocation8 + $0x1a4] ss:$8 sps:$4 sm:$0xff]  }
 0x11a   :  { %1548 = vmatprep.subr.bf16.mxu1 %v2726_v36  ;;  %v2826_v36 = vld [vmem:[#allocation8 + $0x1a0] ss:$8 sps:$4 sm:$0xff]  }
 0x11d   :  { %1549 = vmatpush1.bf16.msra.mxu1 %v2724_v39  ;;  %v2834_v39 = vld [vmem:[#allocation8 + $0x1c4] ss:$8 sps:$4 sm:$0xff]  }
 0x11e   :  { %1550 = vmatprep.subr.bf16.mxu1 %v2729_v40  ;;  %v2832_v40 = vld [vmem:[#allocation8 + $0x1c0] ss:$8 sps:$4 sm:$0xff]  }
 0x121   :  { %1551 = vmatpush1.bf16.msra.mxu1 %v2727_v43  ;;  %v2840_v43 = vld [vmem:[#allocation8 + $0x1e4] ss:$8 sps:$4 sm:$0xff]  }
 0x122   :  { %1552 = vmatprep.subr.bf16.mxu1 %v2732_v44  ;;  %v2838_v44 = vld [vmem:[#allocation8 + $0x1e0] ss:$8 sps:$4 sm:$0xff]  }
 0x125   :  { %1553 = vmatpush1.bf16.msra.mxu1 %v2730_v46  ;;  %v2841_v46 = vld [vmem:[#allocation8 + $0x1f0] ss:$8 sps:$4 sm:$0xff]  }
 0x126   :  { %1554 = vmatprep.subr.bf16.mxu1 %v2735_v47  ;;  %v290_v47 = vsub.s32 2, %v3060_v63 }
 0x129   :  { %1555 = vmatpush1.bf16.msra.mxu1 %v2733_v48  ;;  %v294_v48 = vsub.s32 3, %v3060_v63 }
 0x12a   :  { %1556 = vmatprep.subr.bf16.mxu1 %v2738_v49 }
 0x12d   :  { %1557 = vmatpush1.bf16.msra.mxu1 %v2736_v50 }
 0x12e   :  { %1558 = vmatprep.subr.bf16.mxu1 %v2741_v51 }
 0x131   :  { %1559 = vmatpush1.bf16.msra.mxu1 %v2739_v53 }
 0x132   :  { %1560 = vmatprep.subr.bf16.mxu1 %v2744_v54 }
 0x135   :  { %1561 = vmatpush1.bf16.msra.mxu1 %v2742_v55 }
 0x136   :  { %1571 = vmatprep.subr.bf16.mxu1 %v2747_v56 }
 0x138   :  { %1563 = vmatmul.mubr.bf16.vlgmr.msra.gmra.mrb[4].mxu1 %v3043_v16  ;;  %v3068_v16 = vld [vmem:[%s3110_s2] sm:$0xf] }
 0x139   :  { %1572 = vmatpush1.bf16.msra.mxu1 %v2745_v57  ;;  %1603 = vmatprep.mubr.bf16.mxu1 %v2949_v22  ;;  %v3071_v22 = vsub.s32 1, %v3060_v63  ;;  %v291_v49 = vrot.slane %v3068_v16, %v290_v47  ;;  %v295_v50 = vrot.slane %v3068_v16, %v294_v48 }
 0x13b   :  { %v287_v1 = vrot.slane %v3068_v16, %v3071_v22 }
 0x144   :  { %2348 = vmatmul.mubr.msk.bf16.vlgmr.msra.gmra.mrb[4].mxu1 %vm1280_vm0, %v3049_v27  ;;  %v283_v27 = vrot.slane %v3068_v16, %v3063_v0 }
 0x14b   :  { %v1318_v58 = vpop.f32.mrb[0].mxu1 }
 0x14c   :  { %v1320_v59 = vpop.f32.mrb[1].mxu1  ;;  %v1319_v2 = vadd.f32 %v1318_v58, %v283_v27  ;;  %v1684_v27 = vld [vmem:[%s3112_s4] sm:$0x3] }
 0x14d   :  { %v1322_v60 = vpop.f32.mrb[2].mxu1  ;;  %v1321_v3 = vadd.f32 %v1320_v59, %v287_v1  ;;  %v1689_v1 = vrot.slane %v1684_v27, %v3063_v0  ;;  %v1693_v16 = vrot.slane %v1684_v27, %v3071_v22 }
 0x14e   :  { %v1323_v61 = vpop.f32.mrb[3].mxu1 }
 0x198   :  { %v1441_v4 = vpop.f32.mrb[0].mxu0 }
 0x199   :  { %v2414_v5 = vadd.f32 %v1441_v4, %v1319_v2  ;;  %v1443_v6 = vpop.f32.mrb[1].mxu0  ;;  %v2100_v2 = vld [vmem:[%s3113_s5] sm:$0x3]  ;;  %s2950_s5 = smov [#allocation9]  }
 0x19a   :  { %v2416_v7 = vadd.f32 %v1443_v6, %v1321_v3  ;;  %v1445_v9 = vpop.f32.mrb[2].mxu0  ;;  %v2105_v6 = vrot.slane %v2100_v2, %v3063_v0  ;;  %s2141_s21 = sshll.u32 %s2950_s5, 4  ;;  %s2142_s21 = int_to_ptr.vmem [resolvable:$true] %s2141_s21 }
 0x19b   :  { %v1612_v10 = vmax.f32 %v2414_v5, 0.0  ;;  %v1446_v12 = vpop.f32.mrb[3].mxu0  ;;  %s2918_s22 = scalar_lea.vmem %s2142_s21, 32  ;;  %p2919_p11 = scmp.lt.s32.totalorder %s2142_s21, %s2142_s21 }
 0x19c   :  { %v1613_v13 = vmax.f32 %v2416_v7, 0.0 }
 0x19d   :  { %v1616_v17 = vpack.c.bf16 %v1612_v10, %v1612_v10  ;;  %v2109_v10 = vrot.slane %v2100_v2, %v3071_v22  ;;  %v2127_v22 = vand.u32 127, %v280_v62 }
 0x19e   :  { %v1617_v14 = vpack.c.bf16 %v1613_v13, %v1613_v13 }
 0x1a0   :  { %2048 = vmatprep.mubr.bf16.mxu0 %v1617_v14 }
 0x1a1   :  { %2049 = vmatmul.mubr.bf16.vlgmr.msra.gmra.mrb[4].mxu0 %v1616_v17 }
 0x1a2   :  { %2058 = vmatpush1.bf16.msra.mxu0 %v2796_v15 }
 0x1a3   :  { %2059 = vmatprep.subr.bf16.mxu0 %v2801_v18 }
 0x1a6   :  { %2060 = vmatpush1.bf16.msra.mxu0 %v2799_v19  ;;  %v2118_v19 = vstv %s3114_s6  ;;  %s2914_s6 = scalar_lea.vmem %s2142_s21, 16 }
 0x1a7   :  { %2061 = vmatprep.subr.bf16.mxu0 %v2804_v20  ;;  %p2915_p10 = scmp.ne.s32.totalorder %s2142_s21, %s2914_s6  ;;  %p2920_p12 = scmp.lt.s32.totalorder %s2918_s22, %s2914_s6 }
 0x1a9   :  { %p2921_p13 = por %p2920_p12, %p2919_p11 }
 0x1aa   :  { %2062 = vmatpush1.bf16.msra.mxu0 %v2802_v21 }
 0x1ab   :  { %2063 = vmatprep.subr.bf16.mxu0 %v2807_v23  ;;  %p2922_p0 = pnand %p2921_p13, %p2915_p10 }
 0x1ae   :  { %2064 = vmatpush1.bf16.msra.mxu0 %v2805_v24 }
 0x1af   :  { %2065 = vmatprep.subr.bf16.mxu0 %v2810_v25 }
 0x1b2   :  { %2066 = vmatpush1.bf16.msra.mxu0 %v2808_v11  ;;  %v2130_v11 = vsub.s32 %v2127_v22, %v3060_v63 }
 0x1b3   :  { %2067 = vmatprep.subr.bf16.mxu0 %v2813_v26 }
 0x1b6   :  { %2068 = vmatpush1.bf16.msra.mxu0 %v2811_v35 }
 0x1b7   :  { %2069 = vmatprep.subr.bf16.mxu0 %v2816_v28 }
 0x1ba   :  { %2070 = vmatpush1.bf16.msra.mxu0 %v2814_v8 }
 0x1bb   :  { %2071 = vmatprep.subr.bf16.mxu0 %v2819_v29 }
 0x1be   :  { %2072 = vmatpush1.bf16.msra.mxu0 %v2817_v30 }
 0x1bf   :  { %2073 = vmatprep.subr.bf16.mxu0 %v2822_v31 }
 0x1c2   :  { %2074 = vmatpush1.bf16.msra.mxu0 %v2820_v52 }
 0x1c3   :  { %2075 = vmatprep.subr.bf16.mxu0 %v2825_v32 }
 0x1c6   :  { %2076 = vmatpush1.bf16.msra.mxu0 %v2823_v33 }
 0x1c7   :  { %2077 = vmatprep.subr.bf16.mxu0 %v2828_v34 }
 0x1ca   :  { %2078 = vmatpush1.bf16.msra.mxu0 %v2826_v36 }
 0x1cb   :  { %2079 = vmatprep.subr.bf16.mxu0 %v2831_v37 }
 0x1ce   :  { %2080 = vmatpush1.bf16.msra.mxu0 %v2829_v38 }
 0x1cf   :  { %2081 = vmatprep.subr.bf16.mxu0 %v2834_v39 }
 0x1d2   :  { %2082 = vmatpush1.bf16.msra.mxu0 %v2832_v40 }
 0x1d3   :  { %2083 = vmatprep.subr.bf16.mxu0 %v2837_v41 }
 0x1d6   :  { %2084 = vmatpush1.bf16.msra.mxu0 %v2835_v42 }
 0x1d7   :  { %2085 = vmatprep.subr.bf16.mxu0 %v2840_v43 }
 0x1da   :  { %2086 = vmatpush1.bf16.msra.mxu0 %v2838_v44 }
 0x1db   :  { %2087 = vmatprep.subr.bf16.mxu0 %v2843_v45 }
 0x1de   :  { %2088 = vmatpush1.bf16.msra.mxu0 %v2841_v46 }
 0x217   :  { %v1605_v51 = vpop.f32.mrb[4].mxu1 }
 0x218   :  { %v2417_v53 = vadd.f32 %v1605_v51, %v291_v49  ;;  %v1607_v54 = vpop.f32.mrb[5].mxu1 }
 0x219   :  { %v2418_v55 = vadd.f32 %v1607_v54, %v295_v50  ;;  %v1609_v56 = vpop.f32.mrb[6].mxu1 }
 0x21a   :  { %v1614_v57 = vmax.f32 %v2417_v53, 0.0  ;;  %v1610_v58 = vpop.f32.mrb[7].mxu1 }
 0x21b   :  { %v1615_v59 = vmax.f32 %v2418_v55, 0.0 }
 0x21c   :  { %v1618_v61 = vpack.c.bf16 %v1614_v57, %v1614_v57 }
 0x21d   :  { %v1619_v60 = vpack.c.bf16 %v1615_v59, %v1615_v59 }
 0x21f   :  { %2089 = vmatprep.mubr.bf16.mxu0 %v1619_v60 }
 0x220   :  { %2090 = vmatmul.mubr.bf16.vlgmr.msra.gmra.mrb[4].mxu0 %v1618_v61 }
 0x2f3   :  { %v2091_v3 = vpop.f32.mrb[4].mxu0 }
 0x2f4   :  { %v2419_v4 = vadd.f32 %v2091_v3, %v1689_v1  ;;  %v2093_v5 = vpop.f32.mrb[5].mxu0 }
 0x2f5   :  { %v2420_v7 = vadd.f32 %v2093_v5, %v1693_v16  ;;  %v2095_v9 = vpop.f32.mrb[6].mxu0 }
 0x2f6   :  { %v2098_v12 = vmax.f32 %v2419_v4, 0.0  ;;  %v2096_v13 = vpop.f32.mrb[7].mxu0 }
 0x2f7   :  { %v2099_v14 = vmax.f32 %v2420_v7, 0.0 }
 0x2f8   :  { %v2112_v15 = vmul.f32 %v2105_v6, %v2098_v12 }
 0x2f9   :  { %v2113_v17 = vmul.f32 %v2109_v10, %v2099_v14 }
 0x2fb   :  { %v2114_v18 = vadd.f32 %v2113_v17, %v2112_v15 }
 0x2fd   :  { %2115 = vadd.xlane.f32.xlu0 %v2114_v18 }
 0x38a   :  { %v2116_v20 = vpop.xlane.xlu0 %2115 }
 0x38b   :  { %v2119_v21 = vadd.f32 %v2118_v19, %v2116_v20 }
 0x38d   :  { %v2120_v23 = vsub.f32 0.0, %v2119_v21 }
 0x38f   :  { %v2121_v24 = vmul.f32 1.442695, %v2120_v23 }
 0x391   :  { %2844 = vpow2.f32 %v2121_v24 }
 0x39b   :  { %v2845_v0 = vpop.eup %2844 }
 0x39c   :  { %v2123_v25 = vadd.f32 1.0, %v2845_v0 }
 0x39e   :  { %2846 = vrcp.f32 %v2123_v25 }
 0x3a8   :  { %v2847_v26 = vpop.eup %2846 }
 0x3a9   :  { %v2131_v35 = vrot.slane %v2847_v26, %v2130_v11 }
 0x3ab   :  { %2134 = vst.msk [vmem:[#allocation9] sm:$0x1] %vm2133_vm1, %v2131_v35 }
 0x3ac   :  { %2925 = shalt.err (!%p2922_p0)
}
 0x3ad   :  { %s2926_s26 = scalar_lea.hbm %s3115_s7, 16 }
 0x3ae   :  { %p2927_p1 = scmp.ne.s32.totalorder %s3115_s7, %s2926_s26  ;;  %p2930_p2 = scmp.lt.u32.totalorder %s2926_s26, %s3115_s7 }
 0x3b0   :  { %p2932_p3 = pnand %p2930_p2, %p2927_p1 }
 0x3b2   :  { %2935 = shalt.err (!%p2932_p3)
}
 0x3b3   :  { %2144 = dma.vmem_to_hbm [thread:$0]  %s2142_s21, 16, %s3115_s7, [#allocation5]  }
 0x3b4   :  { %2940 = dma.done.wait [#allocation5], 16  }
 0x3b5   :  { %2941 = vsyncadd [#allocation5], 4294967280 }
 0x3b6   :  { %2148 = vsyncpa [#allocation4], 1 }
 0x3b7   :  { %2149 = vsyncpa [#allocation7], 1 }
 0x3b8   :  { %2150 = vsyncpa [#allocation5], 1 }

</bundles_post_ra>
